<compile_context>
chip_gen: v6e
topology: v6e:2x2x1
jax: 0.10.0
libtpu: 0.0.40
codegen_flags: <defaults>
</compile_context>

<pallas_src>
import functools

import jax
import jax.numpy as jnp
from jax.experimental import pallas as pl
from jax.experimental.pallas import tpu as pltpu


def _round_up(x, m):
    return -(-x // m) * m


def _actor_critic_kernel(x_ref, w1_ref, b1_ref, w2_ref, b2_ref, out_ref):
    """Fused actor+critic forward on one batch tile (two MXU matmuls)."""
    x = x_ref[...]

    h = jnp.dot(x, w1_ref[...], preferred_element_type=jnp.float32) + b1_ref[...]
    h = jnp.maximum(h, 0.0)

    out = (jnp.dot(h.astype(w2_ref.dtype), w2_ref[...],
                   preferred_element_type=jnp.float32)
           + b2_ref[...])
    out_ref[...] = out.astype(out_ref.dtype)


def pack_params(params, dtype=jnp.float32):
    """Pack (w1a, b1a, w2a, b2a, w1c, b1c, w2c, b2c) into fused slabs."""
    w1a, b1a, w2a, b2a, w1c, b1c, w2c, b2c = params
    d_in, hidden = w1a.shape
    n_actions = w2a.shape[1]

    # Fail loudly on configs the packing does not support.
    assert w1c.shape == (d_in, hidden), "actor/critic fc1 must share (d_in, hidden)"
    assert w2a.shape == (hidden, n_actions), "actor fc2 shape mismatch"
    assert w2c.shape == (hidden, 1), "critic fc2 must have a single output"
    assert b1a.shape == (1, hidden) and b1c.shape == (1, hidden)
    assert b2a.shape == (1, n_actions) and b2c.shape == (1, 1)

    # Narrow output slab: [action logits | value | zero pad to multiple of 8].
    out_w = _round_up(n_actions + 1, 8)
    assert n_actions + 1 <= out_w

    # fc1: concat actor|critic along the output axis -> (D_IN, 2*HIDDEN).
    w1 = jnp.concatenate([w1a, w1c], axis=1).astype(dtype)
    b1 = jnp.concatenate([b1a, b1c], axis=1).astype(dtype)

    # fc2: block-diagonal packing into the narrow output slab.
    w2 = jnp.zeros((2 * hidden, out_w), dtype)
    w2 = w2.at[:hidden, :n_actions].set(w2a.astype(dtype))
    w2 = w2.at[hidden:, n_actions:n_actions + 1].set(w2c.astype(dtype))
    b2 = jnp.zeros((1, out_w), dtype)
    b2 = b2.at[:, :n_actions].set(b2a.astype(dtype))
    b2 = b2.at[:, n_actions:n_actions + 1].set(b2c.astype(dtype))

    return w1, b1, w2, b2, n_actions


@functools.partial(jax.jit, static_argnames=("n_actions",))
def _run(state, w1, b1, w2, b2, n_actions):
    B, d_in = state.shape
    two_h = w1.shape[1]
    out_w = w2.shape[1]

    # Match the compute dtype of the packed weights (bf16 production path).
    state = state.astype(w1.dtype)

    # Batch-tile selection:
    #  * cap 4096 rows -> double-buffered lane-padded state+output tiles are
    #    ~8 MiB of VMEM (fits 32 MiB scoped limit and v7x's 64 MiB).
    #  * ~B/2 rows (rounded to 8) so any B >= 16 yields >= 2 grid steps and the
    #    "parallel" axis shards across both v7x TensorCores.
    tile_b = max(8, min(4096, _round_up(pl.cdiv(B, 2), 8)))
    grid_b = pl.cdiv(B, tile_b)  # ragged last tile: OOB reads garbage, OOB writes dropped

    itemsize = jnp.dtype(state.dtype).itemsize
    flops = 2 * B * (d_in * two_h + two_h * out_w)
    bytes_accessed = (B * d_in * itemsize                      # state
                      + B * out_w * 4                          # f32 output
                      + (w1.size + b1.size + w2.size + b2.size) * itemsize)
    cost = pl.CostEstimate(flops=flops, transcendentals=0,
                           bytes_accessed=bytes_accessed)

    out = pl.pallas_call(
        _actor_critic_kernel,
        out_shape=jax.ShapeDtypeStruct((B, out_w), jnp.float32),
        grid=(grid_b,),
        in_specs=[
            pl.BlockSpec((tile_b, d_in), lambda i: (i, 0)),    # state rows
            pl.BlockSpec((d_in, two_h), lambda i: (0, 0)),     # W1 (resident)
            pl.BlockSpec((1, two_h), lambda i: (0, 0)),        # b1 (resident)
            pl.BlockSpec((two_h, out_w), lambda i: (0, 0)),    # W2 (resident)
            pl.BlockSpec((1, out_w), lambda i: (0, 0)),        # b2 (resident)
        ],
        out_specs=pl.BlockSpec((tile_b, out_w), lambda i: (i, 0)),
        compiler_params=pltpu.CompilerParams(
            dimension_semantics=("parallel",),
            vmem_limit_bytes=32 * 1024 * 1024,
        ),
        cost_estimate=cost,
    )(state, w1, b1, w2, b2)

    action_pred = out[:, :n_actions]
    value_pred = out[:, n_actions:n_actions + 1]
    return action_pred, value_pred


def actor_critic_forward(state, params, dtype=None):
    """Fused actor+critic forward: returns (action_pred, value_pred).

    dtype=jnp.bfloat16 halves state/weight DMA bytes (f32 accumulation kept);
    default keeps the state's dtype for exact f32 parity with the reference.
    """
    dtype = state.dtype if dtype is None else dtype
    w1, b1, w2, b2, n_actions = pack_params(params, dtype=dtype)
    return _run(state, w1, b1, w2, b2, n_actions)


def _linear_init(key, fan_in, fan_out, dtype=jnp.float32):
    """PyTorch nn.Linear default init: U(-1/sqrt(fan_in), 1/sqrt(fan_in))."""
    kw, kb = jax.random.split(key)
    bound = 1.0 / jnp.sqrt(jnp.asarray(fan_in, dtype))
    w = jax.random.uniform(kw, (fan_in, fan_out), dtype, -bound, bound)
    b = jax.random.uniform(kb, (1, fan_out), dtype, -bound, bound)
    return w, b


if __name__ == "__main__":
    # Small shapes consistent with a PPO actor-critic on a vector observation.
    B = 8          # batch
    D_IN = 4       # state dim (e.g. CartPole observation)
    HIDDEN = 32
    N_ACTIONS = 2

    key = jax.random.PRNGKey(0)
    ks = jax.random.split(key, 5)

    w1a, b1a = _linear_init(ks[0], D_IN, HIDDEN)
    w2a, b2a = _linear_init(ks[1], HIDDEN, N_ACTIONS)
    w1c, b1c = _linear_init(ks[2], D_IN, HIDDEN)
    w2c, b2c = _linear_init(ks[3], HIDDEN, 1)
    params = (w1a, b1a, w2a, b2a, w1c, b1c, w2c, b2c)

    state = jax.random.normal(ks[4], (B, D_IN), jnp.float32)

    # Pure-JAX reference (f32).
    def ref(x):
        ha = jnp.maximum(x @ w1a + b1a, 0.0)
        ap = ha @ w2a + b2a
        hc = jnp.maximum(x @ w1c + b1c, 0.0)
        vp = hc @ w2c + b2c
        return ap, vp

    ap_ref, vp_ref = ref(state)

    # --- f32 path: exact check against the f32 reference. ---
    action_pred, value_pred = actor_critic_forward(state, params)
    action_pred = jax.block_until_ready(action_pred)
    value_pred = jax.block_until_ready(value_pred)

    assert action_pred.shape == (B, N_ACTIONS)
    assert value_pred.shape == (B, 1)
    assert jnp.allclose(action_pred, ap_ref, atol=1e-5, rtol=1e-5)
    assert jnp.allclose(value_pred, vp_ref, atol=1e-5, rtol=1e-5)

    # --- bf16 production path: halved DMA bytes, looser tolerance. ---
    ap_bf16, vp_bf16 = actor_critic_forward(state, params, dtype=jnp.bfloat16)
    ap_bf16 = jax.block_until_ready(ap_bf16)
    vp_bf16 = jax.block_until_ready(vp_bf16)

    assert ap_bf16.shape == (B, N_ACTIONS)
    assert vp_bf16.shape == (B, 1)
    assert jnp.allclose(ap_bf16, ap_ref, atol=1e-1, rtol=1e-1)
    assert jnp.allclose(vp_bf16, vp_ref, atol=1e-1, rtol=1e-1)

    print("KERNEL_OK")
</pallas_src>

<mosaic_0001>
module attributes {stable_mosaic.version = 11 : i64} {
  func.func @_actor_critic_kernel(%arg0: i32, %arg1: memref<8x4xf32, #tpu.memory_space<vmem>>, %arg2: memref<4x64xf32, #tpu.memory_space<vmem>>, %arg3: memref<1x64xf32, #tpu.memory_space<vmem>>, %arg4: memref<64x8xf32, #tpu.memory_space<vmem>>, %arg5: memref<1x8xf32, #tpu.memory_space<vmem>>, %arg6: memref<8x8xf32, #tpu.memory_space<vmem>>) attributes {dimension_semantics = [#tpu.dimension_semantics<parallel>], iteration_bounds = array<i64: 1>, scalar_prefetch = 0 : i64, scratch_operands = 0 : i64, tpu.core_type = #tpu.core_type<tc>, window_params = [{transform_indices = @transform_0, window_bounds = array<i64: 8, 4>}, {pipeline_mode = #tpu.pipeline_mode<synchronous>, transform_indices = @transform_1, window_bounds = array<i64: 4, 64>}, {pipeline_mode = #tpu.pipeline_mode<synchronous>, transform_indices = @transform_2, window_bounds = array<i64: 1, 64>}, {pipeline_mode = #tpu.pipeline_mode<synchronous>, transform_indices = @transform_3, window_bounds = array<i64: 64, 8>}, {pipeline_mode = #tpu.pipeline_mode<synchronous>, transform_indices = @transform_4, window_bounds = array<i64: 1, 8>}, {transform_indices = @transform_5, window_bounds = array<i64: 8, 8>}]} {
    %c0 = arith.constant 0 : index
    %c0_0 = arith.constant 0 : index
    %0 = vector.load %arg1[%c0, %c0_0] : memref<8x4xf32, #tpu.memory_space<vmem>>, vector<8x4xf32>
    %c0_1 = arith.constant 0 : index
    %c0_2 = arith.constant 0 : index
    %1 = vector.load %arg2[%c0_1, %c0_2] : memref<4x64xf32, #tpu.memory_space<vmem>>, vector<4x64xf32>
    %cst = arith.constant dense<0.000000e+00> : vector<8x64xf32>
    %2 = tpu.matmul %0, %1, %cst {dimension_numbers = #tpu.dot_dimension_numbers<[1], [0], [0], [1], [0, 0, 1, 1], [], []>} : vector<8x4xf32>, vector<4x64xf32>, vector<8x64xf32> -> vector<8x64xf32>
    %c0_3 = arith.constant 0 : index
    %c0_4 = arith.constant 0 : index
    %3 = vector.load %arg3[%c0_3, %c0_4] : memref<1x64xf32, #tpu.memory_space<vmem>>, vector<1x64xf32>
    %4 = vector.broadcast %3 : vector<1x64xf32> to vector<8x64xf32>
    %5 = arith.addf %2, %4 : vector<8x64xf32>
    %cst_5 = arith.constant 0.000000e+00 : f32
    %6 = vector.broadcast %cst_5 : f32 to vector<8x64xf32>
    %7 = arith.maximumf %5, %6 : vector<8x64xf32>
    %c0_6 = arith.constant 0 : index
    %c0_7 = arith.constant 0 : index
    %8 = vector.load %arg4[%c0_6, %c0_7] : memref<64x8xf32, #tpu.memory_space<vmem>>, vector<64x8xf32>
    %cst_8 = arith.constant dense<0.000000e+00> : vector<8x8xf32>
    %9 = tpu.matmul %7, %8, %cst_8 {dimension_numbers = #tpu.dot_dimension_numbers<[1], [0], [0], [1], [0, 0, 1, 1], [], []>} : vector<8x64xf32>, vector<64x8xf32>, vector<8x8xf32> -> vector<8x8xf32>
    %c0_9 = arith.constant 0 : index
    %c0_10 = arith.constant 0 : index
    %10 = vector.load %arg5[%c0_9, %c0_10] : memref<1x8xf32, #tpu.memory_space<vmem>>, vector<1x8xf32>
    %11 = vector.broadcast %10 : vector<1x8xf32> to vector<8x8xf32>
    %12 = arith.addf %9, %11 : vector<8x8xf32>
    %c0_11 = arith.constant 0 : index
    %c0_12 = arith.constant 0 : index
    %13 = vector.load %arg6[%c0_11, %c0_12] : memref<8x8xf32, #tpu.memory_space<vmem>>, vector<8x8xf32>
    tpu.vector_store %arg6[%c0_11, %c0_12], %12 {strides = array<i32>} : memref<8x8xf32, #tpu.memory_space<vmem>>, vector<8x8xf32>,
    return
  }
  func.func @transform_0(%arg0: i32) -> (i32, i32) {
    %c0_i32 = arith.constant 0 : i32
    %c0_i32_0 = arith.constant 0 : i32
    return %arg0, %c0_i32 : i32, i32
  }
  func.func @transform_1(%arg0: i32) -> (i32, i32) {
    %c0_i32 = arith.constant 0 : i32
    %c0_i32_0 = arith.constant 0 : i32
    %c0_i32_1 = arith.constant 0 : i32
    return %c0_i32, %c0_i32_0 : i32, i32
  }
  func.func @transform_2(%arg0: i32) -> (i32, i32) {
    %c0_i32 = arith.constant 0 : i32
    %c0_i32_0 = arith.constant 0 : i32
    %c0_i32_1 = arith.constant 0 : i32
    return %c0_i32, %c0_i32_0 : i32, i32
  }
  func.func @transform_3(%arg0: i32) -> (i32, i32) {
    %c0_i32 = arith.constant 0 : i32
    %c0_i32_0 = arith.constant 0 : i32
    %c0_i32_1 = arith.constant 0 : i32
    return %c0_i32, %c0_i32_0 : i32, i32
  }
  func.func @transform_4(%arg0: i32) -> (i32, i32) {
    %c0_i32 = arith.constant 0 : i32
    %c0_i32_0 = arith.constant 0 : i32
    %c0_i32_1 = arith.constant 0 : i32
    return %c0_i32, %c0_i32_0 : i32, i32
  }
  func.func @transform_5(%arg0: i32) -> (i32, i32) {
    %c0_i32 = arith.constant 0 : i32
    %c0_i32_0 = arith.constant 0 : i32
    return %arg0, %c0_i32 : i32, i32
  }
}

</mosaic_0001>

<bundles_post_ra>
// kernel: _run.1
= control target key start
LH: loop header
LB: loop body
LE: loop exit
PB: predicated region body
PF: predicated region fallthrough
CT: control target
= control target key end

     0   :  { %vm33_vm0 = vcmask 1043456   ;;  %vm29_vm1 = vcmask 31744   ;;  %v245_v0 = vmov 0.0   ;;  %vm246_vm2 = vmmov 0   ;;  %s316_s1 = inlined_call_operand.vmem [shape: f32[4,64], index: 1, kind: input, shape index: {}]   ;;  %s317_s0 = inlined_call_operand.vmem [shape: f32[8,4], index: 0, kind: input, shape index: {}]   ;;  %s318_s3 = inlined_call_operand.vmem [shape: f32[64,8], index: 3, kind: input, shape index: {}]   ;;  %s319_s2 = inlined_call_operand.vmem [shape: f32[1,64], index: 2, kind: input, shape index: {}]   ;;  %s320_s4 = inlined_call_operand.vmem [shape: f32[1,8], index: 4, kind: input, shape index: {}]   ;;  %s321_s5 = inlined_call_operand.vmem [shape: f32[8,8], index: 5, kind: output, shape index: {}]  }
   0x1   :  { %219 = vmatprep.subr.mxu0 %v245_v0  ;;  %v21_v1 = vld [vmem:[%s316_s1] sm:$0xf]  ;;  %221 = vmatprep.mubr.msk.f32.mxu0 %vm246_vm2, %v245_v0  ;;  %v115_v3 = vld [vmem:[%s318_s3 + $0x38] sm:$0xff]  ;;  %v114_v4 = vld [vmem:[%s318_s3 + $0x30] sm:$0xff]  ;;  %vm123_vm3 = vcmask 523264   ;;  %vm197_vm4 = vcmask 64512  }
   0x2   :  { %v20_v2 = vld [vmem:[%s317_s0] sm:$0xff]  ;;  %220 = vmatpush3.msk.msra.mxu0 %vm33_vm0, %v21_v1  ;;  %224 = vmatprep.subr.mxu1 %v245_v0  ;;  %v113_v5 = vld [vmem:[%s318_s3 + $0x28] sm:$0xff]  ;;  %v111_v7 = vld [vmem:[%s318_s3 + $0x18] sm:$0xff] }
   0x3   :  { %222 = vmatmul.mubr.msk.f32.vlgmr.msra.gmra.mxu0 %vm29_vm1, %v20_v2  ;;  %225 = vmatpush3.msra.mxu1 %v115_v3  ;;  %v112_v6 = vld [vmem:[%s318_s3 + $0x20] sm:$0xff]  ;;  %v110_v8 = vld [vmem:[%s318_s3 + $0x10] sm:$0xff]  ;;  %v109_v9 = vld [vmem:[%s318_s3 + $0x8] sm:$0xff] }
   0x4   :  { %226 = vmatprep.subr.mxu1 %v245_v0  ;;  %240 = vmatprep.mubr.msk.f32.mxu1 %vm246_vm2, %v245_v0  ;;  %v108_v10 = vld [vmem:[%s318_s3] sm:$0xff] }
   0x5   :  { %227 = vmatpush3.msra.mxu1 %v114_v4  ;;  %v203_v11 = vld [vmem:[%s319_s2] ss:$0 sm:$0xff] }
   0x6   :  { %228 = vmatprep.subr.mxu1 %v245_v0  ;;  %v206_v16 = vld [vmem:[%s320_s4] ss:$0 sm:$0xff] }
   0x7   :  { %229 = vmatpush3.msra.mxu1 %v113_v5 }
   0x8   :  { %230 = vmatprep.subr.mxu1 %v245_v0 }
   0x9   :  { %231 = vmatpush3.msra.mxu1 %v112_v6 }
   0xa   :  { %232 = vmatprep.subr.mxu1 %v245_v0 }
   0xb   :  { %233 = vmatpush3.msra.mxu1 %v111_v7 }
   0xc   :  { %234 = vmatprep.subr.mxu1 %v245_v0 }
   0xd   :  { %235 = vmatpush3.msra.mxu1 %v110_v8 }
   0xe   :  { %236 = vmatprep.subr.mxu1 %v245_v0 }
   0xf   :  { %237 = vmatpush3.msra.mxu1 %v109_v9 }
  0x10   :  { %238 = vmatprep.subr.mxu1 %v245_v0 }
  0x11   :  { %239 = vmatpush3.msra.mxu1 %v108_v10 }
  0xc3   :  { %v103_v12 = vpop.f32.mrf.mxu0 }
  0xc4   :  { %v104_v13 = vadd.f32 %v203_v11, %v103_v12 }
  0xc5   :  { %v223_v14 = vpop.f32.mrf.mxu0 }
  0xc6   :  { %v107_v15 = vmax.f32 %v104_v13, 0.0 }
  0xc8   :  { %241 = vmatmul.mubr.msk.f32.vlgmr.msra.gmra.mxu1 %vm123_vm3, %v107_v15 }
 0x188   :  { %v193_v17 = vpop.f32.mrf.mxu1 }
 0x189   :  { %v194_v18 = vadd.f32 %v206_v16, %v193_v17 }
 0x18a   :  { %v242_v19 = vpop.f32.mrf.mxu1 }
 0x18b   :  { %198 = vst.msk [vmem:[%s321_s5] sm:$0xff] %vm197_vm4, %v194_v18 }

</bundles_post_ra>
